<compile_context>
chip_gen: v7x
topology: tpu7x:2x2x1
jax: 0.10.0
libtpu: 0.0.40
codegen_flags: <defaults>
</compile_context>

<pallas_src>
import functools

import jax
import jax.numpy as jnp
from jax.experimental import pallas as pl
from jax.experimental.pallas import tpu as pltpu

# ----- model hyper-parameters (synthetic, deterministic) ---------------------
IN_CH = 56          # fixed by the module (Conv3d(56, ...))
FILTER_N = 32       # filter_n
MLP_LEN = 2         # mlp_len
N_OUTPUTS = 8       # n_outputs
KSIZE = 3
K_FLAT = IN_CH * KSIZE * KSIZE * KSIZE  # 1512


def _round_up(x, m):
    return (x + m - 1) // m * m


# ----- Pallas kernel ---------------------------------------------------------
def _head_kernel(m_ref, w1_ref, b1_ref, wm_ref, bm_ref, wf_ref, bf_ref,
                 out_ref, *, rest_len):
    # Fused conv+mean+first-Linear: (TB, K) @ (K, F) + b1, then ReLU.
    h = jnp.dot(m_ref[...], w1_ref[...], preferred_element_type=jnp.float32)
    h = jnp.maximum(h + b1_ref[...], 0.0)
    # Remaining (Linear + ReLU) layers, statically unrolled, on (TB, F) rows.
    for i in range(rest_len):
        h = jnp.dot(h, wm_ref[i], preferred_element_type=jnp.float32) + bm_ref[i]
        h = jnp.maximum(h, 0.0)
    # Final Linear, dense (TB, n_out) store.
    out_ref[...] = (jnp.dot(h, wf_ref[...], preferred_element_type=jnp.float32)
                    + bf_ref[...])


# ----- wrapper ---------------------------------------------------------------
def _mean_patches(x_ncdhw):
    """Exact mean-over-output-positions of the im2col patches.

    x: (B, C, ID, IH, IW) -> (B, C*27) flattened in (c, kd, kh, kw) order,
    matching Wc.reshape(F, -1).  This is a cheap box-mean of x, so the 27x
    im2col blow-up never hits HBM.
    """
    B, C, ID, IH, IW = x_ncdhw.shape
    OD, OH, OW = ID - KSIZE + 1, IH - KSIZE + 1, IW - KSIZE + 1
    cols = []
    for kd in range(KSIZE):
        for kh in range(KSIZE):
            for kw in range(KSIZE):
                cols.append(jnp.mean(
                    x_ncdhw[:, :, kd:kd + OD, kh:kh + OH, kw:kw + OW],
                    axis=(2, 3, 4)))
    m = jnp.stack(cols, axis=-1)      # (B, C, 27) with 27 ordered (kd, kh, kw)
    return m.reshape(B, C * KSIZE * KSIZE * KSIZE)


def cnn_baseline_forward(x, params):
    """x: (B, 2, D1, D2, D3, 28) float32 -> (B, n_outputs) float32."""
    Wc, bc, Wh, bh, Wf, bf = params
    B = x.shape[0]

    # --- plain-JAX glue: cat + transpose + exact box-mean (layout/reduction) --
    xc = jnp.concatenate([x[:, 0], x[:, 1]], axis=-1)    # (B, D1, D2, D3, 56)
    xc = jnp.swapaxes(xc, 1, 4)                           # NCDHW (B, 56, D2, D3, D1)
    m = _mean_patches(xc)                                 # (B, K)

    # --- weight prep: fold conv weight into the first MLP Linear --------------
    wc_flat = Wc.reshape(FILTER_N, K_FLAT)                # (F, K)
    w1 = wc_flat.T @ Wh[0].T                              # (K, F)
    b1 = (bc @ Wh[0].T + bh[0]).reshape(1, FILTER_N)      # (1, F)
    rest_len = MLP_LEN - 1
    if rest_len > 0:
        wm_t = jnp.stack([Wh[i + 1].T for i in range(rest_len)])   # (L-1, F, F)
        bm2 = bh[1:].reshape(rest_len, 1, FILTER_N)                # (L-1, 1, F)
    else:  # dummy (never read: static loop range is 0)
        wm_t = jnp.zeros((1, FILTER_N, FILTER_N), jnp.float32)
        bm2 = jnp.zeros((1, 1, FILTER_N), jnp.float32)
    L = max(rest_len, 1)
    wf_t = Wf.T                                           # (F, n_out)
    bf2 = bf.reshape(1, N_OUTPUTS)                        # (1, n_out)

    # --- batch tiling: TB rows per grid step (sublane-aligned), pad batch -----
    TB = min(_round_up(B, 8), 256)
    BP = _round_up(B, TB)
    if BP != B:
        m = jnp.pad(m, ((0, BP - B), (0, 0)))
    n_tiles = BP // TB

    kernel = functools.partial(_head_kernel, rest_len=rest_len)

    out = pl.pallas_call(
        kernel,
        out_shape=jax.ShapeDtypeStruct((BP, N_OUTPUTS), jnp.float32),
        grid=(n_tiles,),
        in_specs=[
            pl.BlockSpec((TB, K_FLAT), lambda b: (b, 0)),               # mean patches
            pl.BlockSpec((K_FLAT, FILTER_N), lambda b: (0, 0)),         # fused W1
            pl.BlockSpec((1, FILTER_N), lambda b: (0, 0)),              # fused b1
            pl.BlockSpec((L, FILTER_N, FILTER_N), lambda b: (0, 0, 0)), # rest MLP W
            pl.BlockSpec((L, 1, FILTER_N), lambda b: (0, 0, 0)),        # rest MLP b
            pl.BlockSpec((FILTER_N, N_OUTPUTS), lambda b: (0, 0)),      # final W
            pl.BlockSpec((1, N_OUTPUTS), lambda b: (0, 0)),             # final b
        ],
        out_specs=pl.BlockSpec((TB, N_OUTPUTS), lambda b: (b, 0)),
        compiler_params=pltpu.CompilerParams(
            dimension_semantics=("parallel",)),
    )(m, w1, b1, wm_t, bm2, wf_t, bf2)

    return out[:B]


# ----- deterministic parameter init (PyTorch-style uniform fan-in scaling) ---
def init_params(key):
    ks = jax.random.split(key, 6)
    s_conv = 1.0 / jnp.sqrt(float(K_FLAT))
    Wc = jax.random.uniform(ks[0], (FILTER_N, IN_CH, KSIZE, KSIZE, KSIZE),
                            jnp.float32, -s_conv, s_conv)
    bc = jax.random.uniform(ks[1], (FILTER_N,), jnp.float32, -s_conv, s_conv)
    s_h = 1.0 / jnp.sqrt(float(FILTER_N))
    Wh = jax.random.uniform(ks[2], (MLP_LEN, FILTER_N, FILTER_N),
                            jnp.float32, -s_h, s_h)
    bh = jax.random.uniform(ks[3], (MLP_LEN, FILTER_N), jnp.float32, -s_h, s_h)
    Wf = jax.random.uniform(ks[4], (N_OUTPUTS, FILTER_N), jnp.float32, -s_h, s_h)
    bf = jax.random.uniform(ks[5], (N_OUTPUTS,), jnp.float32, -s_h, s_h)
    return Wc, bc, Wh, bh, Wf, bf


# ----- pure-JAX reference (for correctness check) -----------------------------
def reference_forward(x, params):
    Wc, bc, Wh, bh, Wf, bf = params
    xc = jnp.concatenate([x[:, 0], x[:, 1]], axis=-1)
    xc = jnp.swapaxes(xc, 1, 4)
    z = jax.lax.conv_general_dilated(
        xc, Wc, window_strides=(1, 1, 1), padding="VALID",
        dimension_numbers=("NCDHW", "OIDHW", "NCDHW"))
    z = z + bc[None, :, None, None, None]
    h = jnp.mean(z, axis=(2, 3, 4))
    for i in range(MLP_LEN):
        h = jnp.maximum(h @ Wh[i].T + bh[i], 0.0)
    return h @ Wf.T + bf


if __name__ == "__main__":
    key = jax.random.PRNGKey(0)
    pkey, xkey = jax.random.split(key)
    params = init_params(pkey)

    # x: (B, 2, D1, D2, D3, 28) so that cat(dim=-1) gives 56 channels.
    B, D1, D2, D3 = 2, 6, 6, 6
    x = jax.random.normal(xkey, (B, 2, D1, D2, D3, IN_CH // 2), jnp.float32)

    out = jax.block_until_ready(cnn_baseline_forward(x, params))
    ref = jax.block_until_ready(reference_forward(x, params))

    assert out.shape == (B, N_OUTPUTS)
    assert jnp.allclose(out, ref, rtol=1e-4, atol=1e-4), "mismatch vs reference"

    print("KERNEL_OK")
</pallas_src>

<mosaic_0001>
module attributes {stable_mosaic.version = 11 : i64} {
  func.func @_head_kernel(%arg0: i32, %arg1: memref<8x1512xf32, #tpu.memory_space<vmem>>, %arg2: memref<1512x32xf32, #tpu.memory_space<vmem>>, %arg3: memref<1x32xf32, #tpu.memory_space<vmem>>, %arg4: memref<1x32x32xf32, #tpu.memory_space<vmem>>, %arg5: memref<1x1x32xf32, #tpu.memory_space<vmem>>, %arg6: memref<32x8xf32, #tpu.memory_space<vmem>>, %arg7: memref<1x8xf32, #tpu.memory_space<vmem>>, %arg8: memref<8x8xf32, #tpu.memory_space<vmem>>) attributes {dimension_semantics = [#tpu.dimension_semantics<parallel>], iteration_bounds = array<i64: 1>, scalar_prefetch = 0 : i64, scratch_operands = 0 : i64, tpu.core_type = #tpu.core_type<tc>, window_params = [{transform_indices = @transform_0, window_bounds = array<i64: 8, 1512>}, {pipeline_mode = #tpu.pipeline_mode<synchronous>, transform_indices = @transform_1, window_bounds = array<i64: 1512, 32>}, {pipeline_mode = #tpu.pipeline_mode<synchronous>, transform_indices = @transform_2, window_bounds = array<i64: 1, 32>}, {pipeline_mode = #tpu.pipeline_mode<synchronous>, transform_indices = @transform_3, window_bounds = array<i64: 1, 32, 32>}, {pipeline_mode = #tpu.pipeline_mode<synchronous>, transform_indices = @transform_4, window_bounds = array<i64: 1, 1, 32>}, {pipeline_mode = #tpu.pipeline_mode<synchronous>, transform_indices = @transform_5, window_bounds = array<i64: 32, 8>}, {pipeline_mode = #tpu.pipeline_mode<synchronous>, transform_indices = @transform_6, window_bounds = array<i64: 1, 8>}, {transform_indices = @transform_7, window_bounds = array<i64: 8, 8>}]} {
    %c0 = arith.constant 0 : index
    %c0_0 = arith.constant 0 : index
    %0 = vector.load %arg1[%c0, %c0_0] : memref<8x1512xf32, #tpu.memory_space<vmem>>, vector<8x1512xf32>
    %c0_1 = arith.constant 0 : index
    %c0_2 = arith.constant 0 : index
    %1 = vector.load %arg2[%c0_1, %c0_2] : memref<1512x32xf32, #tpu.memory_space<vmem>>, vector<1512x32xf32>
    %cst = arith.constant dense<0.000000e+00> : vector<8x32xf32>
    %2 = tpu.matmul %0, %1, %cst {dimension_numbers = #tpu.dot_dimension_numbers<[1], [0], [0], [1], [0, 0, 1, 1], [], []>} : vector<8x1512xf32>, vector<1512x32xf32>, vector<8x32xf32> -> vector<8x32xf32>
    %c0_3 = arith.constant 0 : index
    %c0_4 = arith.constant 0 : index
    %3 = vector.load %arg3[%c0_3, %c0_4] : memref<1x32xf32, #tpu.memory_space<vmem>>, vector<1x32xf32>
    %4 = vector.broadcast %3 : vector<1x32xf32> to vector<8x32xf32>
    %5 = arith.addf %2, %4 : vector<8x32xf32>
    %cst_5 = arith.constant 0.000000e+00 : f32
    %6 = vector.broadcast %cst_5 : f32 to vector<8x32xf32>
    %7 = arith.maximumf %5, %6 : vector<8x32xf32>
    %c0_6 = arith.constant 0 : index
    %c0_7 = arith.constant 0 : index
    %c0_8 = arith.constant 0 : index
    %8 = vector.load %arg4[%c0_6, %c0_7, %c0_8] : memref<1x32x32xf32, #tpu.memory_space<vmem>>, vector<1x32x32xf32>
    %9 = vector.shape_cast %8 : vector<1x32x32xf32> to vector<32x32xf32>
    %cst_9 = arith.constant dense<0.000000e+00> : vector<8x32xf32>
    %10 = tpu.matmul %7, %9, %cst_9 {dimension_numbers = #tpu.dot_dimension_numbers<[1], [0], [0], [1], [0, 0, 1, 1], [], []>} : vector<8x32xf32>, vector<32x32xf32>, vector<8x32xf32> -> vector<8x32xf32>
    %c0_10 = arith.constant 0 : index
    %c0_11 = arith.constant 0 : index
    %c0_12 = arith.constant 0 : index
    %11 = vector.load %arg5[%c0_10, %c0_11, %c0_12] : memref<1x1x32xf32, #tpu.memory_space<vmem>>, vector<1x1x32xf32>
    %12 = vector.shape_cast %11 : vector<1x1x32xf32> to vector<1x32xf32>
    %13 = vector.broadcast %12 : vector<1x32xf32> to vector<8x32xf32>
    %14 = arith.addf %10, %13 : vector<8x32xf32>
    %cst_13 = arith.constant 0.000000e+00 : f32
    %15 = vector.broadcast %cst_13 : f32 to vector<8x32xf32>
    %16 = arith.maximumf %14, %15 : vector<8x32xf32>
    %c0_14 = arith.constant 0 : index
    %c0_15 = arith.constant 0 : index
    %17 = vector.load %arg6[%c0_14, %c0_15] : memref<32x8xf32, #tpu.memory_space<vmem>>, vector<32x8xf32>
    %cst_16 = arith.constant dense<0.000000e+00> : vector<8x8xf32>
    %18 = tpu.matmul %16, %17, %cst_16 {dimension_numbers = #tpu.dot_dimension_numbers<[1], [0], [0], [1], [0, 0, 1, 1], [], []>} : vector<8x32xf32>, vector<32x8xf32>, vector<8x8xf32> -> vector<8x8xf32>
    %c0_17 = arith.constant 0 : index
    %c0_18 = arith.constant 0 : index
    %19 = vector.load %arg7[%c0_17, %c0_18] : memref<1x8xf32, #tpu.memory_space<vmem>>, vector<1x8xf32>
    %20 = vector.broadcast %19 : vector<1x8xf32> to vector<8x8xf32>
    %21 = arith.addf %18, %20 : vector<8x8xf32>
    %c0_19 = arith.constant 0 : index
    %c0_20 = arith.constant 0 : index
    %22 = vector.load %arg8[%c0_19, %c0_20] : memref<8x8xf32, #tpu.memory_space<vmem>>, vector<8x8xf32>
    tpu.vector_store %arg8[%c0_19, %c0_20], %21 {strides = array<i32>} : memref<8x8xf32, #tpu.memory_space<vmem>>, vector<8x8xf32>,
    return
  }
  func.func @transform_0(%arg0: i32) -> (i32, i32) {
    %c0_i32 = arith.constant 0 : i32
    %c0_i32_0 = arith.constant 0 : i32
    return %arg0, %c0_i32 : i32, i32
  }
  func.func @transform_1(%arg0: i32) -> (i32, i32) {
    %c0_i32 = arith.constant 0 : i32
    %c0_i32_0 = arith.constant 0 : i32
    %c0_i32_1 = arith.constant 0 : i32
    return %c0_i32, %c0_i32_0 : i32, i32
  }
  func.func @transform_2(%arg0: i32) -> (i32, i32) {
    %c0_i32 = arith.constant 0 : i32
    %c0_i32_0 = arith.constant 0 : i32
    %c0_i32_1 = arith.constant 0 : i32
    return %c0_i32, %c0_i32_0 : i32, i32
  }
  func.func @transform_3(%arg0: i32) -> (i32, i32, i32) {
    %c0_i32 = arith.constant 0 : i32
    %c0_i32_0 = arith.constant 0 : i32
    %c0_i32_1 = arith.constant 0 : i32
    %c0_i32_2 = arith.constant 0 : i32
    return %c0_i32, %c0_i32_0, %c0_i32_1 : i32, i32, i32
  }
  func.func @transform_4(%arg0: i32) -> (i32, i32, i32) {
    %c0_i32 = arith.constant 0 : i32
    %c0_i32_0 = arith.constant 0 : i32
    %c0_i32_1 = arith.constant 0 : i32
    %c0_i32_2 = arith.constant 0 : i32
    return %c0_i32, %c0_i32_0, %c0_i32_1 : i32, i32, i32
  }
  func.func @transform_5(%arg0: i32) -> (i32, i32) {
    %c0_i32 = arith.constant 0 : i32
    %c0_i32_0 = arith.constant 0 : i32
    %c0_i32_1 = arith.constant 0 : i32
    return %c0_i32, %c0_i32_0 : i32, i32
  }
  func.func @transform_6(%arg0: i32) -> (i32, i32) {
    %c0_i32 = arith.constant 0 : i32
    %c0_i32_0 = arith.constant 0 : i32
    %c0_i32_1 = arith.constant 0 : i32
    return %c0_i32, %c0_i32_0 : i32, i32
  }
  func.func @transform_7(%arg0: i32) -> (i32, i32) {
    %c0_i32 = arith.constant 0 : i32
    %c0_i32_0 = arith.constant 0 : i32
    return %arg0, %c0_i32 : i32, i32
  }
}

</mosaic_0001>

<bundles_post_ra>
// kernel: tpu_custom_call.1
= control target key start
LH: loop header
LB: loop body
LE: loop exit
PB: predicated region body
PF: predicated region fallthrough
CT: control target
= control target key end

     0   :  { %s2015_s0 = inlined_call_operand.vmem [shape: f32[8,1512], index: 0, kind: input, shape index: {}]   ;;  %s2016_s1 = inlined_call_operand.vmem [shape: f32[1512,32], index: 1, kind: input, shape index: {}]   ;;  %s2017_s2 = inlined_call_operand.vmem [shape: f32[1,32], index: 2, kind: input, shape index: {}]   ;;  %s2018_s3 = inlined_call_operand.vmem [shape: f32[1,32,32], index: 3, kind: input, shape index: {}]   ;;  %s2019_s4 = inlined_call_operand.vmem [shape: f32[1,1,32], index: 4, kind: input, shape index: {}]   ;;  %s2020_s5 = inlined_call_operand.vmem [shape: f32[32,8], index: 5, kind: input, shape index: {}]   ;;  %s2021_s6 = inlined_call_operand.vmem [shape: f32[1,8], index: 6, kind: input, shape index: {}]   ;;  %s2022_s7 = inlined_call_operand.hbm [shape: f32[8,8], index: 7, kind: output, shape index: {}]  }
   0x1   :  { %v55_v0 = vld [vmem:[%s2016_s1 + $0x80] sm:$0xff]  ;;  %v56_v1 = vld [vmem:[%s2016_s1 + $0x88] sm:$0xff]  ;;  %v57_v11 = vld [vmem:[%s2016_s1 + $0x90] sm:$0xff] }
   0x2   :  { %v87_v2 = vld [vmem:[%s2016_s1 + $0x180] sm:$0xff]  ;;  %v1059_v3 = vpack.c.bf16 %v56_v1, %v55_v0  ;;  %v88_v4 = vld [vmem:[%s2016_s1 + $0x188] sm:$0xff]  ;;  %v58_v13 = vld [vmem:[%s2016_s1 + $0x98] sm:$0xff] }
   0x3   :  { %v39_v5 = vld [vmem:[%s2016_s1] sm:$0xff]  ;;  %v40_v6 = vld [vmem:[%s2016_s1 + $0x8] sm:$0xff]  ;;  %v1091_v7 = vpack.c.bf16 %v88_v4, %v87_v2  ;;  %v89_v14 = vld [vmem:[%s2016_s1 + $0x190] sm:$0xff]  ;;  %v1063_v16 = vpack.c.bf16 %v58_v13, %v57_v11 }
   0x4   :  { %v1061_v8 = vpack.c.bf16 %v40_v6, %v39_v5  ;;  %v71_v9 = vld [vmem:[%s2016_s1 + $0x100] sm:$0xff]  ;;  %v72_v10 = vld [vmem:[%s2016_s1 + $0x108] sm:$0xff]  ;;  %1060 = vmatprep.subr.bf16.mxu0 %v1059_v3  ;;  %v90_v15 = vld [vmem:[%s2016_s1 + $0x198] sm:$0xff] }
   0x5   :  { %v1093_v12 = vpack.c.bf16 %v72_v10, %v71_v9  ;;  %1092 = vmatprep.subr.bf16.mxu1 %v1091_v7  ;;  %v1095_v17 = vpack.c.bf16 %v90_v15, %v89_v14  ;;  %v41_v18 = vld [vmem:[%s2016_s1 + $0x10] sm:$0xff]  ;;  %v42_v19 = vld [vmem:[%s2016_s1 + $0x18] sm:$0xff]  ;;  %v59_v23 = vld [vmem:[%s2016_s1 + $0xa0] sm:$0xff] }
   0x6   :  { %1062 = vmatpush3.bf16.msra.mxu0 %v1061_v8  ;;  %v73_v20 = vld [vmem:[%s2016_s1 + $0x110] sm:$0xff]  ;;  %v1065_v21 = vpack.c.bf16 %v42_v19, %v41_v18  ;;  %v74_v22 = vld [vmem:[%s2016_s1 + $0x118] sm:$0xff]  ;;  %v60_v24 = vld [vmem:[%s2016_s1 + $0xa8] sm:$0xff] }
   0x7   :  { %1094 = vmatpush3.bf16.msra.mxu1 %v1093_v12  ;;  %1064 = vmatprep.subr.bf16.mxu0 %v1063_v16  ;;  %v1097_v25 = vpack.c.bf16 %v74_v22, %v73_v20  ;;  %v1067_v26 = vpack.c.bf16 %v60_v24, %v59_v23  ;;  %v91_v27 = vld [vmem:[%s2016_s1 + $0x1a0] sm:$0xff]  ;;  %v92_v28 = vld [vmem:[%s2016_s1 + $0x1a8] sm:$0xff]  ;;  %v61_v35 = vld [vmem:[%s2016_s1 + $0xb0] sm:$0xff] }
   0x8   :  { %1096 = vmatprep.subr.bf16.mxu1 %v1095_v17  ;;  %v43_v29 = vld [vmem:[%s2016_s1 + $0x20] sm:$0xff]  ;;  %v1099_v30 = vpack.c.bf16 %v92_v28, %v91_v27  ;;  %v44_v31 = vld [vmem:[%s2016_s1 + $0x28] sm:$0xff]  ;;  %v62_v36 = vld [vmem:[%s2016_s1 + $0xb8] sm:$0xff] }
   0x9   :  { %v75_v32 = vld [vmem:[%s2016_s1 + $0x120] sm:$0xff]  ;;  %v76_v33 = vld [vmem:[%s2016_s1 + $0x128] sm:$0xff]  ;;  %v1069_v34 = vpack.c.bf16 %v44_v31, %v43_v29  ;;  %v93_v37 = vld [vmem:[%s2016_s1 + $0x1b0] sm:$0xff]  ;;  %v1071_v39 = vpack.c.bf16 %v62_v36, %v61_v35 }
   0xa   :  { %1066 = vmatpush3.bf16.msra.mxu0 %v1065_v21  ;;  %v1101_v38 = vpack.c.bf16 %v76_v33, %v75_v32  ;;  %v94_v40 = vld [vmem:[%s2016_s1 + $0x1b8] sm:$0xff]  ;;  %v45_v41 = vld [vmem:[%s2016_s1 + $0x30] sm:$0xff]  ;;  %v63_v46 = vld [vmem:[%s2016_s1 + $0xc0] sm:$0xff] }
   0xb   :  { %1098 = vmatpush3.bf16.msra.mxu1 %v1097_v25  ;;  %1068 = vmatprep.subr.bf16.mxu0 %v1067_v26  ;;  %v46_v42 = vld [vmem:[%s2016_s1 + $0x38] sm:$0xff]  ;;  %v1103_v43 = vpack.c.bf16 %v94_v40, %v93_v37  ;;  %v77_v44 = vld [vmem:[%s2016_s1 + $0x130] sm:$0xff]  ;;  %v64_v47 = vld [vmem:[%s2016_s1 + $0xc8] sm:$0xff] }
   0xc   :  { %1100 = vmatprep.subr.bf16.mxu1 %v1099_v30  ;;  %v78_v45 = vld [vmem:[%s2016_s1 + $0x138] sm:$0xff]  ;;  %v95_v48 = vld [vmem:[%s2016_s1 + $0x1c0] sm:$0xff]  ;;  %v96_v49 = vld [vmem:[%s2016_s1 + $0x1c8] sm:$0xff]  ;;  %v1073_v50 = vpack.c.bf16 %v46_v42, %v45_v41  ;;  %v1075_v52 = vpack.c.bf16 %v64_v47, %v63_v46 }
   0xd   :  { %v1105_v51 = vpack.c.bf16 %v78_v45, %v77_v44  ;;  %v47_v53 = vld [vmem:[%s2016_s1 + $0x40] sm:$0xff]  ;;  %v48_v54 = vld [vmem:[%s2016_s1 + $0x48] sm:$0xff]  ;;  %v1107_v56 = vpack.c.bf16 %v96_v49, %v95_v48  ;;  %v65_v58 = vld [vmem:[%s2016_s1 + $0xd0] sm:$0xff] }
   0xe   :  { %1070 = vmatpush3.bf16.msra.mxu0 %v1069_v34  ;;  %v79_v55 = vld [vmem:[%s2016_s1 + $0x140] sm:$0xff]  ;;  %v80_v57 = vld [vmem:[%s2016_s1 + $0x148] sm:$0xff]  ;;  %v66_v59 = vld [vmem:[%s2016_s1 + $0xd8] sm:$0xff]  ;;  %v1077_v62 = vpack.c.bf16 %v48_v54, %v47_v53 }
   0xf   :  { %1102 = vmatpush3.bf16.msra.mxu1 %v1101_v38  ;;  %1072 = vmatprep.subr.bf16.mxu0 %v1071_v39  ;;  %v97_v60 = vld [vmem:[%s2016_s1 + $0x1d0] sm:$0xff]  ;;  %v98_v61 = vld [vmem:[%s2016_s1 + $0x1d8] sm:$0xff]  ;;  %v1109_v63 = vpack.c.bf16 %v80_v57, %v79_v55  ;;  %v1079_v0 = vpack.c.bf16 %v66_v59, %v65_v58  ;;  %v67_v6 = vld [vmem:[%s2016_s1 + $0xe0] sm:$0xff] }
  0x10   :  { %1104 = vmatprep.subr.bf16.mxu1 %v1103_v43  ;;  %v49_v1 = vld [vmem:[%s2016_s1 + $0x50] sm:$0xff]  ;;  %v50_v2 = vld [vmem:[%s2016_s1 + $0x58] sm:$0xff]  ;;  %v1111_v4 = vpack.c.bf16 %v98_v61, %v97_v60  ;;  %v68_v7 = vld [vmem:[%s2016_s1 + $0xe8] sm:$0xff] }
  0x11   :  { %v81_v3 = vld [vmem:[%s2016_s1 + $0x150] sm:$0xff]  ;;  %v82_v5 = vld [vmem:[%s2016_s1 + $0x158] sm:$0xff]  ;;  %v99_v8 = vld [vmem:[%s2016_s1 + $0x1e0] sm:$0xff]  ;;  %v1081_v10 = vpack.c.bf16 %v50_v2, %v49_v1  ;;  %v1083_v14 = vpack.c.bf16 %v68_v7, %v67_v6 }
  0x12   :  { %1074 = vmatpush3.bf16.msra.mxu0 %v1073_v50  ;;  %v100_v9 = vld [vmem:[%s2016_s1 + $0x1e8] sm:$0xff]  ;;  %v51_v11 = vld [vmem:[%s2016_s1 + $0x60] sm:$0xff]  ;;  %v1113_v13 = vpack.c.bf16 %v82_v5, %v81_v3  ;;  %v30_v17 = vld [vmem:[%s2015_s0 + $0x18] sm:$0xff] }
  0x13   :  { %1106 = vmatpush3.bf16.msra.mxu1 %v1105_v51  ;;  %1076 = vmatprep.subr.bf16.mxu0 %v1075_v52  ;;  %v52_v12 = vld [vmem:[%s2016_s1 + $0x68] sm:$0xff]  ;;  %v83_v15 = vld [vmem:[%s2016_s1 + $0x160] sm:$0xff]  ;;  %v1115_v18 = vpack.c.bf16 %v100_v9, %v99_v8  ;;  %v69_v20 = vld [vmem:[%s2016_s1 + $0xf0] sm:$0xff] }
  0x14   :  { %1108 = vmatprep.subr.bf16.mxu1 %v1107_v56  ;;  %v28_v16 = vld [vmem:[%s2015_s0 + $0x8] sm:$0xff]  ;;  %v70_v21 = vld [vmem:[%s2016_s1 + $0xf8] sm:$0xff]  ;;  %v101_v22 = vld [vmem:[%s2016_s1 + $0x1f0] sm:$0xff]  ;;  %373 = vmatprep.mubr.f32.mxu1 %v30_v17  ;;  %v1085_v24 = vpack.c.bf16 %v52_v12, %v51_v11 }
  0x15   :  { %v84_v19 = vld [vmem:[%s2016_s1 + $0x168] sm:$0xff]  ;;  %303 = vmatprep.mubr.f32.mxu0 %v28_v16  ;;  %v102_v23 = vld [vmem:[%s2016_s1 + $0x1f8] sm:$0xff]  ;;  %v1087_v26 = vpack.c.bf16 %v70_v21, %v69_v20  ;;  %v53_v27 = vld [vmem:[%s2016_s1 + $0x70] sm:$0xff] }
  0x16   :  { %1078 = vmatpush3.bf16.msra.mxu0 %v1077_v62  ;;  %v1117_v25 = vpack.c.bf16 %v84_v19, %v83_v15  ;;  %v54_v28 = vld [vmem:[%s2016_s1 + $0x78] sm:$0xff]  ;;  %v85_v29 = vld [vmem:[%s2016_s1 + $0x170] sm:$0xff]  ;;  %v1119_v30 = vpack.c.bf16 %v102_v23, %v101_v22  ;;  %v119_v32 = vld [vmem:[%s2016_s1 + $0x280] sm:$0xff] }
  0x17   :  { %1110 = vmatpush3.bf16.msra.mxu1 %v1109_v63  ;;  %1080 = vmatprep.subr.bf16.mxu0 %v1079_v0  ;;  %v86_v31 = vld [vmem:[%s2016_s1 + $0x178] sm:$0xff]  ;;  %v120_v33 = vld [vmem:[%s2016_s1 + $0x288] sm:$0xff]  ;;  %v151_v34 = vld [vmem:[%s2016_s1 + $0x380] sm:$0xff]  ;;  %v1089_v36 = vpack.c.bf16 %v54_v28, %v53_v27 }
  0x18   :  { %1112 = vmatprep.subr.bf16.mxu1 %v1111_v4  ;;  %v152_v35 = vld [vmem:[%s2016_s1 + $0x388] sm:$0xff]  ;;  %v1121_v37 = vpack.c.bf16 %v86_v31, %v85_v29  ;;  %v1123_v38 = vpack.c.bf16 %v120_v33, %v119_v32  ;;  %v103_v39 = vld [vmem:[%s2016_s1 + $0x200] sm:$0xff]  ;;  %v121_v44 = vld [vmem:[%s2016_s1 + $0x290] sm:$0xff] }
  0x19   :  { %v104_v40 = vld [vmem:[%s2016_s1 + $0x208] sm:$0xff]  ;;  %v135_v41 = vld [vmem:[%s2016_s1 + $0x300] sm:$0xff]  ;;  %v1155_v42 = vpack.c.bf16 %v152_v35, %v151_v34  ;;  %v122_v45 = vld [vmem:[%s2016_s1 + $0x298] sm:$0xff] }
  0x1a   :  { %1082 = vmatpush3.bf16.msra.mxu0 %v1081_v10  ;;  %v136_v43 = vld [vmem:[%s2016_s1 + $0x308] sm:$0xff]  ;;  %v153_v46 = vld [vmem:[%s2016_s1 + $0x390] sm:$0xff]  ;;  %v154_v47 = vld [vmem:[%s2016_s1 + $0x398] sm:$0xff]  ;;  %v1125_v50 = vpack.c.bf16 %v104_v40, %v103_v39  ;;  %v1127_v52 = vpack.c.bf16 %v122_v45, %v121_v44 }
  0x1b   :  { %1114 = vmatpush3.bf16.msra.mxu1 %v1113_v13  ;;  %1084 = vmatprep.subr.bf16.mxu0 %v1083_v14  ;;  %v27_v48 = vld [vmem:[%s2015_s0] sm:$0xff]  ;;  %v29_v49 = vld [vmem:[%s2015_s0 + $0x10] sm:$0xff]  ;;  %v1157_v51 = vpack.c.bf16 %v136_v43, %v135_v41  ;;  %v106_v54 = vld [vmem:[%s2016_s1 + $0x218] sm:$0xff]  ;;  %v1159_v56 = vpack.c.bf16 %v154_v47, %v153_v46 }
  0x1c   :  { %1116 = vmatprep.subr.bf16.mxu1 %v1115_v18  ;;  %v105_v53 = vld [vmem:[%s2016_s1 + $0x210] sm:$0xff]  ;;  %v138_v57 = vld [vmem:[%s2016_s1 + $0x318] sm:$0xff]  ;;  %v123_v58 = vld [vmem:[%s2016_s1 + $0x2a0] sm:$0xff] }
  0x1d   :  { %v137_v55 = vld [vmem:[%s2016_s1 + $0x310] sm:$0xff]  ;;  %v124_v59 = vld [vmem:[%s2016_s1 + $0x2a8] sm:$0xff]  ;;  %v155_v60 = vld [vmem:[%s2016_s1 + $0x3a0] sm:$0xff]  ;;  %v1129_v62 = vpack.c.bf16 %v106_v54, %v105_v53 }
  0x1e   :  { %1086 = vmatpush3.bf16.msra.mxu0 %v1085_v24  ;;  %v156_v61 = vld [vmem:[%s2016_s1 + $0x3a8] sm:$0xff]  ;;  %v1161_v63 = vpack.c.bf16 %v138_v57, %v137_v55  ;;  %v1131_v0 = vpack.c.bf16 %v124_v59, %v123_v58  ;;  %v107_v1 = vld [vmem:[%s2016_s1 + $0x220] sm:$0xff]  ;;  %v125_v6 = vld [vmem:[%s2016_s1 + $0x2b0] sm:$0xff] }
  0x1f   :  { %1118 = vmatpush3.bf16.msra.mxu1 %v1117_v25  ;;  %1088 = vmatprep.subr.bf16.mxu0 %v1087_v26  ;;  %v108_v2 = vld [vmem:[%s2016_s1 + $0x228] sm:$0xff]  ;;  %v139_v3 = vld [vmem:[%s2016_s1 + $0x320] sm:$0xff]  ;;  %v1163_v4 = vpack.c.bf16 %v156_v61, %v155_v60  ;;  %v126_v7 = vld [vmem:[%s2016_s1 + $0x2b8] sm:$0xff] }
  0x20   :  { %1120 = vmatprep.subr.bf16.mxu1 %v1119_v30  ;;  %v140_v5 = vld [vmem:[%s2016_s1 + $0x328] sm:$0xff]  ;;  %v157_v8 = vld [vmem:[%s2016_s1 + $0x3b0] sm:$0xff]  ;;  %v158_v9 = vld [vmem:[%s2016_s1 + $0x3b8] sm:$0xff]  ;;  %v1133_v10 = vpack.c.bf16 %v108_v2, %v107_v1  ;;  %v1135_v12 = vpack.c.bf16 %v126_v7, %v125_v6 }
  0x21   :  { %v1165_v11 = vpack.c.bf16 %v140_v5, %v139_v3  ;;  %v109_v13 = vld [vmem:[%s2016_s1 + $0x230] sm:$0xff]  ;;  %v110_v14 = vld [vmem:[%s2016_s1 + $0x238] sm:$0xff]  ;;  %v1167_v16 = vpack.c.bf16 %v158_v9, %v157_v8  ;;  %v127_v18 = vld [vmem:[%s2016_s1 + $0x2c0] sm:$0xff] }
  0x22   :  { %1090 = vmatpush3.bf16.msra.mxu0 %v1089_v36  ;;  %v141_v15 = vld [vmem:[%s2016_s1 + $0x330] sm:$0xff]  ;;  %v142_v17 = vld [vmem:[%s2016_s1 + $0x338] sm:$0xff]  ;;  %v128_v19 = vld [vmem:[%s2016_s1 + $0x2c8] sm:$0xff]  ;;  %v1137_v22 = vpack.c.bf16 %v110_v14, %v109_v13 }
  0x23   :  { %1122 = vmatpush3.bf16.msra.mxu1 %v1121_v37  ;;  %1124 = vmatprep.subr.bf16.mxu0 %v1123_v38  ;;  %v159_v20 = vld [vmem:[%s2016_s1 + $0x3c0] sm:$0xff]  ;;  %v160_v21 = vld [vmem:[%s2016_s1 + $0x3c8] sm:$0xff]  ;;  %v34_v24 = vld [vmem:[%s2015_s0 + $0x38] sm:$0xff]  ;;  %v1169_v25 = vpack.c.bf16 %v142_v17, %v141_v15  ;;  %v1139_v26 = vpack.c.bf16 %v128_v19, %v127_v18 }
  0x24   :  { %1156 = vmatprep.subr.bf16.mxu1 %v1155_v42  ;;  %v32_v23 = vld [vmem:[%s2015_s0 + $0x28] sm:$0xff]  ;;  %v111_v27 = vld [vmem:[%s2016_s1 + $0x240] sm:$0xff]  ;;  %v1171_v30 = vpack.c.bf16 %v160_v21, %v159_v20  ;;  %v129_v32 = vld [vmem:[%s2016_s1 + $0x2d0] sm:$0xff] }
  0x25   :  { %304 = vmatmul.mubr.f32.vlgmr.msra.gmra.mrb[0].mxu0 %v27_v48  ;;  %v112_v28 = vld [vmem:[%s2016_s1 + $0x248] sm:$0xff]  ;;  %v143_v29 = vld [vmem:[%s2016_s1 + $0x340] sm:$0xff]  ;;  %v130_v33 = vld [vmem:[%s2016_s1 + $0x2d8] sm:$0xff] }
  0x26   :  { %374 = vmatmul.mubr.f32.vlgmr.msra.gmra.mrb[0].mxu1 %v29_v49  ;;  %1126 = vmatpush3.bf16.msra.mxu0 %v1125_v50  ;;  %v144_v31 = vld [vmem:[%s2016_s1 + $0x348] sm:$0xff]  ;;  %v161_v34 = vld [vmem:[%s2016_s1 + $0x3d0] sm:$0xff]  ;;  %v162_v35 = vld [vmem:[%s2016_s1 + $0x3d8] sm:$0xff]  ;;  %v1141_v36 = vpack.c.bf16 %v112_v28, %v111_v27  ;;  %v1143_v38 = vpack.c.bf16 %v130_v33, %v129_v32 }
  0x27   :  { %1158 = vmatpush3.bf16.msra.mxu1 %v1157_v51  ;;  %1128 = vmatprep.subr.bf16.mxu0 %v1127_v52  ;;  %v1173_v37 = vpack.c.bf16 %v144_v31, %v143_v29  ;;  %v113_v39 = vld [vmem:[%s2016_s1 + $0x250] sm:$0xff]  ;;  %v114_v40 = vld [vmem:[%s2016_s1 + $0x258] sm:$0xff]  ;;  %v1175_v42 = vpack.c.bf16 %v162_v35, %v161_v34  ;;  %v131_v44 = vld [vmem:[%s2016_s1 + $0x2e0] sm:$0xff] }
  0x28   :  { %1160 = vmatprep.subr.bf16.mxu1 %v1159_v56  ;;  %443 = vmatprep.mubr.f32.mxu0 %v32_v23  ;;  %v145_v41 = vld [vmem:[%s2016_s1 + $0x350] sm:$0xff]  ;;  %v146_v43 = vld [vmem:[%s2016_s1 + $0x358] sm:$0xff]  ;;  %v132_v45 = vld [vmem:[%s2016_s1 + $0x2e8] sm:$0xff]  ;;  %v1145_v48 = vpack.c.bf16 %v114_v40, %v113_v39  ;;  %v1301_v23 = vmov 0.0|0.0  }
  0x29   :  { %513 = vmatprep.mubr.f32.mxu1 %v34_v24  ;;  %v163_v46 = vld [vmem:[%s2016_s1 + $0x3e0] sm:$0xff]  ;;  %v164_v47 = vld [vmem:[%s2016_s1 + $0x3e8] sm:$0xff]  ;;  %v1177_v49 = vpack.c.bf16 %v146_v43, %v145_v41  ;;  %v1147_v50 = vpack.c.bf16 %v132_v45, %v131_v44  ;;  %v133_v56 = vld [vmem:[%s2016_s1 + $0x2f0] sm:$0xff] }
  0x2a   :  { %1130 = vmatpush3.bf16.msra.mxu0 %v1129_v62  ;;  %v115_v51 = vld [vmem:[%s2016_s1 + $0x260] sm:$0xff]  ;;  %v116_v52 = vld [vmem:[%s2016_s1 + $0x268] sm:$0xff]  ;;  %v1179_v54 = vpack.c.bf16 %v164_v47, %v163_v46  ;;  %v134_v57 = vld [vmem:[%s2016_s1 + $0x2f8] sm:$0xff] }
  0x2b   :  { %1162 = vmatpush3.bf16.msra.mxu1 %v1161_v63  ;;  %1132 = vmatprep.subr.bf16.mxu0 %v1131_v0  ;;  %v147_v53 = vld [vmem:[%s2016_s1 + $0x360] sm:$0xff]  ;;  %v148_v55 = vld [vmem:[%s2016_s1 + $0x368] sm:$0xff]  ;;  %v165_v58 = vld [vmem:[%s2016_s1 + $0x3f0] sm:$0xff]  ;;  %v1149_v60 = vpack.c.bf16 %v116_v52, %v115_v51  ;;  %v1151_v62 = vpack.c.bf16 %v134_v57, %v133_v56 }
  0x2c   :  { %1164 = vmatprep.subr.bf16.mxu1 %v1163_v4  ;;  %v166_v59 = vld [vmem:[%s2016_s1 + $0x3f8] sm:$0xff]  ;;  %v1181_v61 = vpack.c.bf16 %v148_v55, %v147_v53  ;;  %v117_v63 = vld [vmem:[%s2016_s1 + $0x270] sm:$0xff]  ;;  %v183_v4 = vld [vmem:[%s2016_s1 + $0x480] sm:$0xff] }
  0x2d   :  { %v118_v0 = vld [vmem:[%s2016_s1 + $0x278] sm:$0xff]  ;;  %v149_v1 = vld [vmem:[%s2016_s1 + $0x370] sm:$0xff]  ;;  %v1183_v2 = vpack.c.bf16 %v166_v59, %v165_v58  ;;  %v184_v5 = vld [vmem:[%s2016_s1 + $0x488] sm:$0xff] }
  0x2e   :  { %1134 = vmatpush3.bf16.msra.mxu0 %v1133_v10  ;;  %v150_v3 = vld [vmem:[%s2016_s1 + $0x378] sm:$0xff]  ;;  %v1153_v6 = vpack.c.bf16 %v118_v0, %v117_v63  ;;  %v1187_v8 = vpack.c.bf16 %v184_v5, %v183_v4  ;;  %v167_v9 = vld [vmem:[%s2016_s1 + $0x400] sm:$0xff]  ;;  %v168_v10 = vld [vmem:[%s2016_s1 + $0x408] sm:$0xff] }
  0x2f   :  { %1166 = vmatpush3.bf16.msra.mxu1 %v1165_v11  ;;  %1136 = vmatprep.subr.bf16.mxu0 %v1135_v12  ;;  %v1185_v7 = vpack.c.bf16 %v150_v3, %v149_v1  ;;  %v199_v11 = vld [vmem:[%s2016_s1 + $0x500] sm:$0xff]  ;;  %v200_v12 = vld [vmem:[%s2016_s1 + $0x508] sm:$0xff]  ;;  %v185_v13 = vld [vmem:[%s2016_s1 + $0x490] sm:$0xff]  ;;  %v1189_v17 = vpack.c.bf16 %v168_v10, %v167_v9 }
  0x30   :  { %1168 = vmatprep.subr.bf16.mxu1 %v1167_v16  ;;  %v186_v14 = vld [vmem:[%s2016_s1 + $0x498] sm:$0xff]  ;;  %v31_v15 = vld [vmem:[%s2015_s0 + $0x20] sm:$0xff]  ;;  %v33_v16 = vld [vmem:[%s2015_s0 + $0x30] sm:$0xff]  ;;  %v1220_v18 = vpack.c.bf16 %v200_v12, %v199_v11 }
  0x31   :  { %v1191_v19 = vpack.c.bf16 %v186_v14, %v185_v13  ;;  %v169_v20 = vld [vmem:[%s2016_s1 + $0x410] sm:$0xff]  ;;  %v170_v21 = vld [vmem:[%s2016_s1 + $0x418] sm:$0xff]  ;;  %v36_v27 = vld [vmem:[%s2015_s0 + $0x48] sm:$0xff] }
  0x32   :  { %1138 = vmatpush3.bf16.msra.mxu0 %v1137_v22  ;;  %v201_v22 = vld [vmem:[%s2016_s1 + $0x510] sm:$0xff]  ;;  %v202_v24 = vld [vmem:[%s2016_s1 + $0x518] sm:$0xff] }
  0x33   :  { %1170 = vmatpush3.bf16.msra.mxu1 %v1169_v25  ;;  %1140 = vmatprep.subr.bf16.mxu0 %v1139_v26  ;;  %v187_v25 = vld [vmem:[%s2016_s1 + $0x4a0] sm:$0xff]  ;;  %v188_v26 = vld [vmem:[%s2016_s1 + $0x4a8] sm:$0xff] }
  0x34   :  { %1172 = vmatprep.subr.bf16.mxu1 %v1171_v30 }
  0x36   :  { %1142 = vmatpush3.bf16.msra.mxu0 %v1141_v36 }
  0x37   :  { %1174 = vmatpush3.bf16.msra.mxu1 %v1173_v37  ;;  %1144 = vmatprep.subr.bf16.mxu0 %v1143_v38 }
  0x38   :  { %1176 = vmatprep.subr.bf16.mxu1 %v1175_v42 }
  0x3a   :  { %1146 = vmatpush3.bf16.msra.mxu0 %v1145_v48 }
  0x3b   :  { %1178 = vmatpush3.bf16.msra.mxu1 %v1177_v49  ;;  %1148 = vmatprep.subr.bf16.mxu0 %v1147_v50 }
  0x3c   :  { %1180 = vmatprep.subr.bf16.mxu1 %v1179_v54 }
  0x3e   :  { %1150 = vmatpush3.bf16.msra.mxu0 %v1149_v60 }
  0x3f   :  { %1182 = vmatpush3.bf16.msra.mxu1 %v1181_v61  ;;  %1152 = vmatprep.subr.bf16.mxu0 %v1151_v62 }
  0x40   :  { %1184 = vmatprep.subr.bf16.mxu1 %v1183_v2 }
  0x42   :  { %1154 = vmatpush3.bf16.msra.mxu0 %v1153_v6 }
  0x43   :  { %1186 = vmatpush3.bf16.msra.mxu1 %v1185_v7  ;;  %1188 = vmatprep.subr.bf16.mxu0 %v1187_v8 }
  0x44   :  { %1219 = vmatprep.subr.bf16.mxu1 %v1301_v23 }
  0x45   :  { %444 = vmatmul.mubr.f32.vlgmr.msra.gmra.mrb[2].mxu0 %v31_v15 }
  0x46   :  { %12 = vsyncpa [#allocation3], 0  ;;  %514 = vmatmul.mubr.f32.vlgmr.msra.gmra.mrb[2].mxu1 %v33_v16  ;;  %1190 = vmatpush3.bf16.msra.mxu0 %v1189_v17  ;;  %v1193_v28 = vpack.c.bf16 %v170_v21, %v169_v20  ;;  %v38_v29 = vld [vmem:[%s2015_s0 + $0x58] sm:$0xff]  ;;  %vm235_vm0 = vcmask 850944   ;;  %v1223_v30 = vpack.c.bf16 %v202_v24, %v201_v22  ;;  %v1195_v31 = vpack.c.bf16 %v188_v26, %v187_v25  ;;  %v171_v32 = vld [vmem:[%s2016_s1 + $0x420] sm:$0xff]  ;;  %s1304_s30 = smov [#allocation2]  }
  0x47   :  { %1221 = vmatpush1.bf16.msra.mxu1 %v1220_v18  ;;  %1192 = vmatprep.subr.bf16.mxu0 %v1191_v19  ;;  %v172_v33 = vld [vmem:[%s2016_s1 + $0x428] sm:$0xff]  ;;  %v203_v34 = vld [vmem:[%s2016_s1 + $0x520] sm:$0xff]  ;;  %v189_v36 = vld [vmem:[%s2016_s1 + $0x4b0] sm:$0xff]  ;;  %vm1303_vm1 = vmmov 0   ;;  %vm671_vm2 = vcmask 261120   ;;  %s838_s8 = sshll.u32 %s1304_s30, 4  ;;  %s839_s8 = int_to_ptr.vmem [resolvable:$true] %s838_s8 }
  0x48   :  { %1222 = vmatprep.subr.bf16.mxu1 %v1301_v23  ;;  %v204_v35 = vld [vmem:[%s2016_s1 + $0x528] sm:$0xff]  ;;  %v190_v37 = vld [vmem:[%s2016_s1 + $0x4b8] sm:$0xff]  ;;  %583 = vmatprep.mubr.f32.mxu0 %v36_v27  ;;  %v1197_v38 = vpack.c.bf16 %v172_v33, %v171_v32  ;;  %v173_v41 = vld [vmem:[%s2016_s1 + $0x430] sm:$0xff]  ;;  %vm830_vm3 = vcmask 64512   ;;  %p1282_p1 = scmp.lt.s32.totalorder %s839_s8, %s839_s8 }
  0x49   :  { %847 = vmatprep.mubr.msk.f32.mxu1 %vm235_vm0, %v38_v29  ;;  %v1226_v39 = vpack.c.bf16 %v204_v35, %v203_v34  ;;  %v1199_v40 = vpack.c.bf16 %v190_v37, %v189_v36  ;;  %v174_v42 = vld [vmem:[%s2016_s1 + $0x438] sm:$0xff]  ;;  %v205_v43 = vld [vmem:[%s2016_s1 + $0x530] sm:$0xff]  ;;  %v191_v45 = vld [vmem:[%s2016_s1 + $0x4c0] sm:$0xff] }
  0x4a   :  { %1194 = vmatpush3.bf16.msra.mxu0 %v1193_v28  ;;  %v206_v44 = vld [vmem:[%s2016_s1 + $0x538] sm:$0xff]  ;;  %v192_v46 = vld [vmem:[%s2016_s1 + $0x4c8] sm:$0xff]  ;;  %v1201_v47 = vpack.c.bf16 %v174_v42, %v173_v41  ;;  %v175_v50 = vld [vmem:[%s2016_s1 + $0x440] sm:$0xff] }
  0x4b   :  { %1224 = vmatpush1.bf16.msra.mxu1 %v1223_v30  ;;  %1196 = vmatprep.subr.bf16.mxu0 %v1195_v31  ;;  %v1229_v48 = vpack.c.bf16 %v206_v44, %v205_v43  ;;  %v1203_v49 = vpack.c.bf16 %v192_v46, %v191_v45  ;;  %v176_v51 = vld [vmem:[%s2016_s1 + $0x448] sm:$0xff]  ;;  %v207_v52 = vld [vmem:[%s2016_s1 + $0x540] sm:$0xff]  ;;  %v193_v54 = vld [vmem:[%s2016_s1 + $0x4d0] sm:$0xff] }
  0x4c   :  { %1225 = vmatprep.subr.bf16.mxu1 %v1301_v23  ;;  %v208_v53 = vld [vmem:[%s2016_s1 + $0x548] sm:$0xff]  ;;  %v194_v55 = vld [vmem:[%s2016_s1 + $0x4d8] sm:$0xff]  ;;  %v1205_v56 = vpack.c.bf16 %v176_v51, %v175_v50  ;;  %v177_v59 = vld [vmem:[%s2016_s1 + $0x450] sm:$0xff] }
  0x4d   :  { %v1232_v57 = vpack.c.bf16 %v208_v53, %v207_v52  ;;  %v1207_v58 = vpack.c.bf16 %v194_v55, %v193_v54  ;;  %v178_v60 = vld [vmem:[%s2016_s1 + $0x458] sm:$0xff]  ;;  %v209_v61 = vld [vmem:[%s2016_s1 + $0x550] sm:$0xff]  ;;  %v195_v63 = vld [vmem:[%s2016_s1 + $0x4e0] sm:$0xff] }
  0x4e   :  { %1198 = vmatpush3.bf16.msra.mxu0 %v1197_v38  ;;  %v210_v62 = vld [vmem:[%s2016_s1 + $0x558] sm:$0xff]  ;;  %v196_v0 = vld [vmem:[%s2016_s1 + $0x4e8] sm:$0xff]  ;;  %v1209_v1 = vpack.c.bf16 %v178_v60, %v177_v59  ;;  %v179_v4 = vld [vmem:[%s2016_s1 + $0x460] sm:$0xff] }
  0x4f   :  { %1227 = vmatpush1.bf16.msra.mxu1 %v1226_v39  ;;  %1200 = vmatprep.subr.bf16.mxu0 %v1199_v40  ;;  %v1235_v2 = vpack.c.bf16 %v210_v62, %v209_v61  ;;  %v1211_v3 = vpack.c.bf16 %v196_v0, %v195_v63  ;;  %v180_v5 = vld [vmem:[%s2016_s1 + $0x468] sm:$0xff]  ;;  %v211_v6 = vld [vmem:[%s2016_s1 + $0x560] sm:$0xff]  ;;  %v197_v8 = vld [vmem:[%s2016_s1 + $0x4f0] sm:$0xff]  ;;  %v1302_v39 = vmov 0.0  }
  0x50   :  { %1228 = vmatprep.subr.bf16.mxu1 %v1301_v23  ;;  %v212_v7 = vld [vmem:[%s2016_s1 + $0x568] sm:$0xff]  ;;  %v198_v9 = vld [vmem:[%s2016_s1 + $0x4f8] sm:$0xff]  ;;  %v1213_v10 = vpack.c.bf16 %v180_v5, %v179_v4  ;;  %v181_v13 = vld [vmem:[%s2016_s1 + $0x470] sm:$0xff] }
  0x51   :  { %v1238_v11 = vpack.c.bf16 %v212_v7, %v211_v6  ;;  %v1215_v12 = vpack.c.bf16 %v198_v9, %v197_v8  ;;  %v182_v14 = vld [vmem:[%s2016_s1 + $0x478] sm:$0xff]  ;;  %v213_v15 = vld [vmem:[%s2016_s1 + $0x570] sm:$0xff]  ;;  %v215_v19 = vld [vmem:[%s2016_s1 + $0x580] sm:$0xff] }
  0x52   :  { %1202 = vmatpush3.bf16.msra.mxu0 %v1201_v47  ;;  %v214_v16 = vld [vmem:[%s2016_s1 + $0x578] sm:$0xff]  ;;  %v1217_v17 = vpack.c.bf16 %v182_v14, %v181_v13  ;;  %v216_v20 = vld [vmem:[%s2016_s1 + $0x588] sm:$0xff]  ;;  %v35_v21 = vld [vmem:[%s2015_s0 + $0x40] sm:$0xff] }
  0x53   :  { %1230 = vmatpush1.bf16.msra.mxu1 %v1229_v48  ;;  %1204 = vmatprep.subr.bf16.mxu0 %v1203_v49  ;;  %v1241_v18 = vpack.c.bf16 %v214_v16, %v213_v15  ;;  %v1244_v22 = vpack.c.bf16 %v216_v20, %v215_v19  ;;  %v217_v24 = vld [vmem:[%s2016_s1 + $0x590] sm:$0xff]  ;;  %v218_v25 = vld [vmem:[%s2016_s1 + $0x598] sm:$0xff]  ;;  %v219_v27 = vld [vmem:[%s2016_s1 + $0x5a0] sm:$0xff] }
  0x54   :  { %1231 = vmatprep.subr.bf16.mxu1 %v1301_v23  ;;  %v1247_v26 = vpack.c.bf16 %v218_v25, %v217_v24  ;;  %v220_v28 = vld [vmem:[%s2016_s1 + $0x5a8] sm:$0xff]  ;;  %v221_v30 = vld [vmem:[%s2016_s1 + $0x5b0] sm:$0xff]  ;;  %v222_v31 = vld [vmem:[%s2016_s1 + $0x5b8] sm:$0xff] }
  0x55   :  { %v1250_v29 = vpack.c.bf16 %v220_v28, %v219_v27  ;;  %v1253_v32 = vpack.c.bf16 %v222_v31, %v221_v30  ;;  %v223_v33 = vld [vmem:[%s2016_s1 + $0x5c0] sm:$0xff]  ;;  %v224_v34 = vld [vmem:[%s2016_s1 + $0x5c8] sm:$0xff]  ;;  %v225_v36 = vld [vmem:[%s2016_s1 + $0x5d0] sm:$0xff] }
  0x56   :  { %1206 = vmatpush3.bf16.msra.mxu0 %v1205_v56  ;;  %v1256_v35 = vpack.c.bf16 %v224_v34, %v223_v33  ;;  %v226_v37 = vld [vmem:[%s2016_s1 + $0x5d8] sm:$0xff]  ;;  %v227_v40 = vld [vmem:[%s2016_s1 + $0x5e0] sm:$0xff]  ;;  %v37_v41 = vld [vmem:[%s2015_s0 + $0x50] sm:$0xff] }
  0x57   :  { %1233 = vmatpush1.bf16.msra.mxu1 %v1232_v57  ;;  %1208 = vmatprep.subr.bf16.mxu0 %v1207_v58  ;;  %v1259_v38 = vpack.c.bf16 %v226_v37, %v225_v36  ;;  %v660_v42 = vld [vmem:[%s2018_s3] sm:$0xff]  ;;  %v661_v43 = vld [vmem:[%s2018_s3 + $0x8] sm:$0xff]  ;;  %v662_v45 = vld [vmem:[%s2018_s3 + $0x10] sm:$0xff] }
  0x58   :  { %1234 = vmatprep.subr.bf16.mxu1 %v1301_v23  ;;  %v1262_v44 = vpack.c.bf16 %v661_v43, %v660_v42  ;;  %v663_v46 = vld [vmem:[%s2018_s3 + $0x18] sm:$0xff]  ;;  %v846_v50 = vld [vmem:[%s2017_s2] ss:$0 sm:$0xff]  ;;  %v747_v6 = vld [vmem:[%s2020_s5 + $0x8] sm:$0xff] }
  0x59   :  { %v1265_v47 = vpack.c.bf16 %v663_v46, %v662_v45  ;;  %v746_v5 = vld [vmem:[%s2020_s5] sm:$0xff]  ;;  %v749_v13 = vld [vmem:[%s2020_s5 + $0x18] sm:$0xff] }
  0x5a   :  { %1210 = vmatpush3.bf16.msra.mxu0 %v1209_v1  ;;  %v848_v15 = vld [vmem:[%s2019_s4] ss:$0 sm:$0xff] }
  0x5b   :  { %1236 = vmatpush1.bf16.msra.mxu1 %v1235_v2  ;;  %1212 = vmatprep.subr.bf16.mxu0 %v1211_v3 }
  0x5c   :  { %1237 = vmatprep.subr.bf16.mxu1 %v1301_v23 }
  0x5e   :  { %1214 = vmatpush3.bf16.msra.mxu0 %v1213_v10  ;;  %v1268_v10 = vpack.c.bf16 %v747_v6, %v746_v5 }
  0x5f   :  { %1239 = vmatpush1.bf16.msra.mxu1 %v1238_v11  ;;  %1216 = vmatprep.subr.bf16.mxu0 %v1215_v12  ;;  %v748_v12 = vld [vmem:[%s2020_s5 + $0x10] sm:$0xff]  ;;  %s1277_s5 = scalar_lea.vmem %s839_s8, 128 }
  0x60   :  { %1240 = vmatprep.subr.bf16.mxu1 %v1301_v23  ;;  %v1271_v14 = vpack.c.bf16 %v749_v13, %v748_v12  ;;  %p1278_p0 = scmp.ne.s32.totalorder %s839_s8, %s1277_s5  ;;  %p1283_p2 = scmp.lt.s32.totalorder %s1277_s5, %s1277_s5 }
  0x62   :  { %1218 = vmatpush3.bf16.msra.mxu0 %v1217_v17  ;;  %p1284_p3 = por %p1283_p2, %p1282_p1 }
  0x63   :  { %1242 = vmatpush1.bf16.msra.mxu1 %v1241_v18  ;;  %1261 = vmatprep.subr.bf16.mxu0 %v1301_v23 }
  0x64   :  { %1243 = vmatprep.subr.bf16.mxu1 %v1301_v23  ;;  %p1285_p4 = pnand %p1284_p3, %p1278_p0 }
  0x65   :  { %584 = vmatmul.mubr.f32.vlgmr.msra.gmra.mrb[4].mxu0 %v35_v21 }
  0x66   :  { %1263 = vmatpush3.bf16.msra.mxu0 %v1262_v44  ;;  %1045 = vmatprep.mubr.msk.f32.mxu0 %vm1303_vm1, %v1302_v39 }
  0x67   :  { %1245 = vmatpush1.bf16.msra.mxu1 %v1244_v22  ;;  %1264 = vmatprep.subr.bf16.mxu0 %v1301_v23 }
  0x68   :  { %1246 = vmatprep.subr.bf16.mxu1 %v1301_v23 }
  0x6a   :  { %1266 = vmatpush3.bf16.msra.mxu0 %v1265_v47 }
  0x6b   :  { %1248 = vmatpush1.bf16.msra.mxu1 %v1247_v26  ;;  %1267 = vmatprep.subr.bf16.mxu0 %v1301_v23 }
  0x6c   :  { %1249 = vmatprep.subr.bf16.mxu1 %v1301_v23 }
  0x6f   :  { %1251 = vmatpush1.bf16.msra.mxu1 %v1250_v29 }
  0x70   :  { %1252 = vmatprep.subr.bf16.mxu1 %v1301_v23 }
  0x73   :  { %1254 = vmatpush1.bf16.msra.mxu1 %v1253_v32 }
  0x74   :  { %1255 = vmatprep.subr.bf16.mxu1 %v1301_v23 }
  0x77   :  { %1257 = vmatpush1.bf16.msra.mxu1 %v1256_v35 }
  0x78   :  { %1258 = vmatprep.subr.bf16.mxu1 %v1301_v23 }
  0x7b   :  { %1260 = vmatpush1.bf16.msra.mxu1 %v1259_v38 }
  0x7c   :  { %645 = vmatprep.subr.mxu1 %v1302_v39 }
  0x7f   :  { %646 = vmatpush1.msra.mxu1 %v227_v40 }
  0x80   :  { %654 = vmatmul.mubr.f32.vlgmr.msra.gmra.mrb[4].mxu1 %v37_v41 }
  0xf8   :  { %v884_v48 = vpop.f32.mrb[0].mxu0 }
  0xf9   :  { %v919_v49 = vpop.f32.mrb[0].mxu1  ;;  %v885_v51 = vpop.f32.mrb[1].mxu0 }
  0xfa   :  { %v886_v52 = vadd.f32 %v885_v51, %v884_v48  ;;  %v920_v53 = vpop.f32.mrb[1].mxu1 }
  0xfb   :  { %v921_v54 = vadd.f32 %v920_v53, %v919_v49 }
  0xfc   :  { %v306_v55 = vadd.f32 %v886_v52, %v846_v50 }
  0xfe   :  { %v376_v56 = vadd.f32 %v921_v54, %v306_v55 }
 0x118   :  { %v954_v57 = vpop.f32.mrb[2].mxu0 }
 0x119   :  { %v989_v58 = vpop.f32.mrb[2].mxu1  ;;  %v955_v59 = vpop.f32.mrb[3].mxu0 }
 0x11a   :  { %v956_v60 = vadd.f32 %v955_v59, %v954_v57  ;;  %v990_v61 = vpop.f32.mrb[3].mxu1 }
 0x11b   :  { %v991_v62 = vadd.f32 %v990_v61, %v989_v58 }
 0x11c   :  { %v446_v63 = vadd.f32 %v956_v60, %v376_v56 }
 0x11e   :  { %v516_v0 = vadd.f32 %v991_v62, %v446_v63 }
 0x138   :  { %v1024_v1 = vpop.f32.mrb[4].mxu0 }
 0x139   :  { %v1025_v2 = vpop.f32.mrb[5].mxu0 }
 0x13a   :  { %v1026_v3 = vadd.f32 %v1025_v2, %v1024_v1 }
 0x13c   :  { %v586_v4 = vadd.f32 %v1026_v3, %v516_v0 }
 0x153   :  { %v655_v7 = vpop.f32.mrb[4].mxu1 }
 0x154   :  { %v656_v8 = vadd.f32 %v655_v7, %v586_v4  ;;  %v657_v9 = vpop.f32.mrb[5].mxu1 }
 0x156   :  { %v659_v11 = vmax.f32 %v656_v8, 0.0 }
 0x158   :  { %1046 = vmatmul.mubr.msk.f32.vlgmr.msra.gmra.mrb[6].mxu0 %vm671_vm2, %v659_v11 }
 0x159   :  { %1269 = vmatpush3.bf16.msra.mxu0 %v1268_v10  ;;  %1056 = vmatprep.mubr.msk.f32.mxu0 %vm1303_vm1, %v1302_v39 }
 0x15a   :  { %1270 = vmatprep.subr.bf16.mxu0 %v1301_v23  ;;  %v850_v23 = vld [vmem:[%s2021_s6] ss:$0 sm:$0xff] }
 0x15d   :  { %1272 = vmatpush3.bf16.msra.mxu0 %v1271_v14 }
 0x22b   :  { %v741_v16 = vpop.f32.mrb[6].mxu0 }
 0x22c   :  { %v742_v17 = vadd.f32 %v848_v15, %v741_v16  ;;  %v1047_v18 = vpop.f32.mrb[7].mxu0 }
 0x22e   :  { %v745_v19 = vmax.f32 %v742_v17, 0.0 }
 0x230   :  { %1057 = vmatmul.mubr.msk.f32.vlgmr.msra.gmra.mrb[8].mxu0 %vm671_vm2, %v745_v19 }
 0x303   :  { %v826_v20 = vpop.f32.mrb[8].mxu0 }
 0x304   :  { %v827_v21 = vadd.f32 %v850_v23, %v826_v20  ;;  %v1058_v22 = vpop.f32.mrb[9].mxu0 }
 0x306   :  { %831 = vst.msk [vmem:[#allocation2] sm:$0xff] %vm830_vm3, %v827_v21 }
 0x307   :  { %1288 = shalt.err (!%p1285_p4)
}
 0x308   :  { %s1289_s10 = scalar_lea.hbm %s2022_s7, 128 }
 0x309   :  { %p1290_p5 = scmp.ne.s32.totalorder %s2022_s7, %s1289_s10  ;;  %p1293_p6 = scmp.lt.u32.totalorder %s1289_s10, %s2022_s7 }
 0x30b   :  { %p1295_p7 = pnand %p1293_p6, %p1290_p5 }
 0x30d   :  { %1298 = shalt.err (!%p1295_p7)
}
 0x30e   :  { %841 = dma.vmem_to_hbm [thread:$0]  %s839_s8, 128, %s2022_s7, [#allocation3]  }
 0x30f   :  { %1299 = dma.done.wait [#allocation3], 128  }
 0x310   :  { %1300 = vsyncadd [#allocation3], 4294967168 }
 0x311   :  { %845 = vsyncpa [#allocation3], 1 }

</bundles_post_ra>
